<compile_context>
chip_gen: v6e
topology: v6e:2x2x1
jax: 0.10.0
libtpu: 0.0.40
codegen_flags: <defaults>
</compile_context>

<pallas_src>
import jax
import jax.numpy as jnp
from jax.experimental import pallas as pl
from jax.experimental.pallas import tpu as pltpu

EMBED = 300          # embedding_length of AttentivePooling2
LANE = 128
NEG_FILL = -1000000000.0


# ------------------------------ Pallas kernel -------------------------------
def _attentive_pooling_kernel(q_ref, a_ref, u_ref,
                              sq_ref, pv_ref, sa_ref, cv_ref):
    # One (protein, ligand) pair per grid step.
    q = q_ref[0]            # [Lq, Ep]  protein tokens (zero-padded embedding)
    a = a_ref[0]            # [La, Ep]  ligand  tokens
    u = u_ref[...]          # [Ep, Ep]  bilinear weight (zero-padded)

    # G = tanh(Q @ U @ A^T): two MXU matmuls; the second contracts the
    # lane-resident embedding axis of both operands (q@k^T pattern).
    qu = jnp.dot(q, u, preferred_element_type=jnp.float32)               # [Lq, Ep]
    g = jnp.tanh(jnp.einsum('qe,ke->qk', qu, a,
                            preferred_element_type=jnp.float32))         # [Lq, La]

    # --- protein side: softmax over the Lq (sublane) axis --------------------
    g_q = jnp.max(g, axis=1, keepdims=True)                              # [Lq, 1]
    g_q = jnp.where(g_q == 0.0, NEG_FILL, g_q)                           # masked_fill
    m_q = jnp.max(g_q, axis=0, keepdims=True)
    e_q = jnp.exp(g_q - m_q)
    sigma_q = e_q * pl.reciprocal(jnp.sum(e_q, axis=0, keepdims=True),
                                  approx=True)                           # [Lq, 1]
    prot_vec = jnp.sum(q * sigma_q, axis=0, keepdims=True)               # [1, Ep]

    # --- ligand side: softmax over the La (lane) axis -------------------------
    g_a = jnp.max(g, axis=0, keepdims=True)                              # [1, La]
    g_a = jnp.where(g_a == 0.0, NEG_FILL, g_a)
    m_a = jnp.max(g_a, axis=1, keepdims=True)
    e_a = jnp.exp(g_a - m_a)
    sigma_a = e_a * pl.reciprocal(jnp.sum(e_a, axis=1, keepdims=True),
                                  approx=True)                           # [1, La]
    chem_vec = jnp.dot(sigma_a, a, preferred_element_type=jnp.float32)   # [1, Ep]

    sq_ref[0] = sigma_q
    pv_ref[0] = prot_vec
    sa_ref[0] = sigma_a
    cv_ref[0] = chem_vec


# --------------------------------- wrapper -----------------------------------
def attentive_pooling2(protein, ligand, U):
    """protein: [B, Lq, E], ligand: [B, La, E], U: [E, E] (module parameter)."""
    B, Lq, E = protein.shape
    _, La, _ = ligand.shape
    assert U.shape == (E, E)

    Ep = ((E + LANE - 1) // LANE) * LANE          # lane-dense embedding (300 -> 384)
    pad_e = Ep - E
    # zero padding done wrapper-side (never inside the kernel); zero columns of
    # Q/A/U contribute nothing, so the first E lanes are exact.
    q_p = jnp.pad(protein.astype(jnp.float32), ((0, 0), (0, 0), (0, pad_e)))
    a_p = jnp.pad(ligand.astype(jnp.float32), ((0, 0), (0, 0), (0, pad_e)))
    u_p = jnp.pad(U.astype(jnp.float32), ((0, pad_e), (0, pad_e)))

    grid_spec = pltpu.PrefetchScalarGridSpec(
        num_scalar_prefetch=0,
        grid=(B,),
        in_specs=[
            pl.BlockSpec((1, Lq, Ep), lambda b: (b, 0, 0)),
            pl.BlockSpec((1, La, Ep), lambda b: (b, 0, 0)),
            pl.BlockSpec((Ep, Ep), lambda b: (0, 0)),
        ],
        out_specs=[
            pl.BlockSpec((1, Lq, 1), lambda b: (b, 0, 0)),
            pl.BlockSpec((1, 1, Ep), lambda b: (b, 0, 0)),
            pl.BlockSpec((1, 1, La), lambda b: (b, 0, 0)),
            pl.BlockSpec((1, 1, Ep), lambda b: (b, 0, 0)),
        ],
    )

    sq, pv, sa, cv = pl.pallas_call(
        _attentive_pooling_kernel,
        grid_spec=grid_spec,
        out_shape=(
            jax.ShapeDtypeStruct((B, Lq, 1), jnp.float32),
            jax.ShapeDtypeStruct((B, 1, Ep), jnp.float32),
            jax.ShapeDtypeStruct((B, 1, La), jnp.float32),
            jax.ShapeDtypeStruct((B, 1, Ep), jnp.float32),
        ),
        compiler_params=pltpu.CompilerParams(
            dimension_semantics=("parallel",)),
    )(q_p, a_p, u_p)

    sigma_q = sq[:, :, 0]        # [B, Lq]
    prot_vec = pv[:, 0, :E]      # [B, E]
    sigma_a = sa[:, 0, :]        # [B, La]
    chem_vec = cv[:, 0, :E]      # [B, E]
    return sigma_q, prot_vec, sigma_a, chem_vec


# ------------------------- pure-JAX reference (check) ------------------------
def _reference(protein, ligand, U):
    QU = jnp.einsum('bqe,ef->bqf', protein, U)
    G = jnp.tanh(jnp.einsum('bqf,bkf->bqk', QU, ligand))
    g_q = jnp.max(G, axis=2)
    g_a = jnp.max(G, axis=1)

    def attention(g, X):
        g = jnp.where(g == 0.0, NEG_FILL, g)
        sigma = jax.nn.softmax(g, axis=-1)
        vec = jnp.sum(X * sigma[:, :, None], axis=1)
        return sigma, vec

    sigma_q, prot_vec = attention(g_q, protein)
    sigma_a, chem_vec = attention(g_a, ligand)
    return sigma_q, prot_vec, sigma_a, chem_vec


# ----------------------------------- main ------------------------------------
if __name__ == "__main__":
    key = jax.random.PRNGKey(0)
    k_prot, k_lig, k_u = jax.random.split(key, 3)

    B, Lq, La, E = 2, 16, 8, EMBED
    protein = jax.random.uniform(k_prot, (B, Lq, E), jnp.float32)
    ligand = jax.random.uniform(k_lig, (B, La, E), jnp.float32)
    # NOTE: the PyTorch module initializes U to zeros (degenerate: uniform
    # attention). A small random U exercises the full forward path; the
    # forward semantics are identical either way.
    U = jax.random.uniform(k_u, (E, E), jnp.float32, -0.05, 0.05)

    outs = attentive_pooling2(protein, ligand, U)
    outs = jax.block_until_ready(outs)
    sigma_q, prot_vec, sigma_a, chem_vec = outs

    ref_sq, ref_pv, ref_sa, ref_cv = _reference(protein, ligand, U)

    assert sigma_q.shape == (B, Lq) and sigma_a.shape == (B, La)
    assert prot_vec.shape == (B, E) and chem_vec.shape == (B, E)
    assert all(o.dtype == jnp.float32 for o in outs)
    assert jnp.allclose(sigma_q, ref_sq, rtol=1e-2, atol=1e-3), "sigma_q mismatch"
    assert jnp.allclose(prot_vec, ref_pv, rtol=1e-2, atol=1e-3), "prot_vec mismatch"
    assert jnp.allclose(sigma_a, ref_sa, rtol=1e-2, atol=1e-3), "sigma_a mismatch"
    assert jnp.allclose(chem_vec, ref_cv, rtol=1e-2, atol=1e-3), "chem_vec mismatch"

    print("KERNEL_OK")
</pallas_src>

<mosaic_0001>
module attributes {stable_mosaic.version = 11 : i64} {
  func.func @_attentive_pooling_kernel(%arg0: i32, %arg1: memref<1x16x384xf32, #tpu.memory_space<vmem>>, %arg2: memref<1x8x384xf32, #tpu.memory_space<vmem>>, %arg3: memref<384x384xf32, #tpu.memory_space<vmem>>, %arg4: memref<1x16x1xf32, #tpu.memory_space<vmem>>, %arg5: memref<1x1x384xf32, #tpu.memory_space<vmem>>, %arg6: memref<1x1x8xf32, #tpu.memory_space<vmem>>, %arg7: memref<1x1x384xf32, #tpu.memory_space<vmem>>) attributes {dimension_semantics = [#tpu.dimension_semantics<parallel>], iteration_bounds = array<i64: 2>, scalar_prefetch = 0 : i64, scratch_operands = 0 : i64, tpu.core_type = #tpu.core_type<tc>, window_params = [{transform_indices = @transform_0, window_bounds = array<i64: 1, 16, 384>}, {transform_indices = @transform_1, window_bounds = array<i64: 1, 8, 384>}, {pipeline_mode = #tpu.pipeline_mode<synchronous>, transform_indices = @transform_2, window_bounds = array<i64: 384, 384>}, {transform_indices = @transform_3, window_bounds = array<i64: 1, 16, 1>}, {transform_indices = @transform_4, window_bounds = array<i64: 1, 1, 384>}, {transform_indices = @transform_5, window_bounds = array<i64: 1, 1, 8>}, {transform_indices = @transform_6, window_bounds = array<i64: 1, 1, 384>}]} {
    %c0 = arith.constant 0 : index
    %c0_0 = arith.constant 0 : index
    %c0_1 = arith.constant 0 : index
    %0 = vector.load %arg1[%c0, %c0_0, %c0_1] : memref<1x16x384xf32, #tpu.memory_space<vmem>>, vector<1x16x384xf32>
    %1 = vector.shape_cast %0 : vector<1x16x384xf32> to vector<16x384xf32>
    %c0_2 = arith.constant 0 : index
    %c0_3 = arith.constant 0 : index
    %c0_4 = arith.constant 0 : index
    %2 = vector.load %arg2[%c0_2, %c0_3, %c0_4] : memref<1x8x384xf32, #tpu.memory_space<vmem>>, vector<1x8x384xf32>
    %3 = vector.shape_cast %2 : vector<1x8x384xf32> to vector<8x384xf32>
    %c0_5 = arith.constant 0 : index
    %c0_6 = arith.constant 0 : index
    %4 = vector.load %arg3[%c0_5, %c0_6] : memref<384x384xf32, #tpu.memory_space<vmem>>, vector<384x384xf32>
    %cst = arith.constant dense<0.000000e+00> : vector<16x384xf32>
    %5 = tpu.matmul %1, %4, %cst {dimension_numbers = #tpu.dot_dimension_numbers<[1], [0], [0], [1], [0, 0, 1, 1], [], []>} : vector<16x384xf32>, vector<384x384xf32>, vector<16x384xf32> -> vector<16x384xf32>
    "tpu.trace_start"() <{level = 10 : i32, message = "qe,ke->qk"}> : () -> ()
    %cst_7 = arith.constant dense<0.000000e+00> : vector<16x8xf32>
    %6 = tpu.matmul %5, %3, %cst_7 {dimension_numbers = #tpu.dot_dimension_numbers<[1], [1], [0], [0], [0, 0, 1, 0], [], []>} : vector<16x384xf32>, vector<8x384xf32>, vector<16x8xf32> -> vector<16x8xf32>
    "tpu.trace_stop"() : () -> ()
    %7 = math.tanh %6 : vector<16x8xf32>
    %cst_8 = arith.constant dense<0xFF800000> : vector<16xf32>
    %8 = vector.multi_reduction <maximumf>, %7, %cst_8 [1] : vector<16x8xf32> to vector<16xf32>
    %9 = vector.shape_cast %8 : vector<16xf32> to vector<16x1xf32>
    %cst_9 = arith.constant 0.000000e+00 : f32
    %10 = vector.broadcast %cst_9 : f32 to vector<16x1xf32>
    %11 = arith.cmpf oeq, %9, %10 : vector<16x1xf32>
    %cst_10 = arith.constant -1.000000e+09 : f32
    %12 = vector.broadcast %cst_10 : f32 to vector<16x1xf32>
    %13 = arith.select %11, %12, %9 : vector<16x1xi1>, vector<16x1xf32>
    %cst_11 = arith.constant dense<0xFF800000> : vector<1xf32>
    %14 = vector.multi_reduction <maximumf>, %13, %cst_11 [0] : vector<16x1xf32> to vector<1xf32>
    %15 = vector.shape_cast %14 : vector<1xf32> to vector<1x1xf32>
    %16 = vector.broadcast %15 : vector<1x1xf32> to vector<16x1xf32>
    %17 = arith.subf %13, %16 : vector<16x1xf32>
    %18 = math.exp %17 : vector<16x1xf32>
    %cst_12 = arith.constant dense<0.000000e+00> : vector<1xf32>
    %19 = vector.multi_reduction <add>, %18, %cst_12 [0] : vector<16x1xf32> to vector<1xf32>
    %20 = vector.shape_cast %19 : vector<1xf32> to vector<1x1xf32>
    %21 = tpu.reciprocal %20 {approx = true} : vector<1x1xf32> -> vector<1x1xf32>
    %22 = vector.broadcast %21 : vector<1x1xf32> to vector<16x1xf32>
    %23 = arith.mulf %18, %22 : vector<16x1xf32>
    %24 = vector.broadcast %23 : vector<16x1xf32> to vector<16x384xf32>
    %25 = arith.mulf %1, %24 : vector<16x384xf32>
    %cst_13 = arith.constant dense<0.000000e+00> : vector<384xf32>
    %26 = vector.multi_reduction <add>, %25, %cst_13 [0] : vector<16x384xf32> to vector<384xf32>
    %27 = vector.shape_cast %26 : vector<384xf32> to vector<1x384xf32>
    %cst_14 = arith.constant dense<0xFF800000> : vector<8xf32>
    %28 = vector.multi_reduction <maximumf>, %7, %cst_14 [0] : vector<16x8xf32> to vector<8xf32>
    %29 = vector.shape_cast %28 : vector<8xf32> to vector<1x8xf32>
    %cst_15 = arith.constant 0.000000e+00 : f32
    %30 = vector.broadcast %cst_15 : f32 to vector<1x8xf32>
    %31 = arith.cmpf oeq, %29, %30 : vector<1x8xf32>
    %cst_16 = arith.constant -1.000000e+09 : f32
    %32 = vector.broadcast %cst_16 : f32 to vector<1x8xf32>
    %33 = arith.select %31, %32, %29 : vector<1x8xi1>, vector<1x8xf32>
    %cst_17 = arith.constant dense<0xFF800000> : vector<1xf32>
    %34 = vector.multi_reduction <maximumf>, %33, %cst_17 [1] : vector<1x8xf32> to vector<1xf32>
    %35 = vector.shape_cast %34 : vector<1xf32> to vector<1x1xf32>
    %36 = vector.broadcast %35 : vector<1x1xf32> to vector<1x8xf32>
    %37 = arith.subf %33, %36 : vector<1x8xf32>
    %38 = math.exp %37 : vector<1x8xf32>
    %cst_18 = arith.constant dense<0.000000e+00> : vector<1xf32>
    %39 = vector.multi_reduction <add>, %38, %cst_18 [1] : vector<1x8xf32> to vector<1xf32>
    %40 = vector.shape_cast %39 : vector<1xf32> to vector<1x1xf32>
    %41 = tpu.reciprocal %40 {approx = true} : vector<1x1xf32> -> vector<1x1xf32>
    %42 = vector.broadcast %41 : vector<1x1xf32> to vector<1x8xf32>
    %43 = arith.mulf %38, %42 : vector<1x8xf32>
    %cst_19 = arith.constant dense<0.000000e+00> : vector<1x384xf32>
    %44 = tpu.matmul %43, %3, %cst_19 {dimension_numbers = #tpu.dot_dimension_numbers<[1], [0], [0], [1], [0, 0, 1, 1], [], []>} : vector<1x8xf32>, vector<8x384xf32>, vector<1x384xf32> -> vector<1x384xf32>
    %c0_20 = arith.constant 0 : index
    %c0_21 = arith.constant 0 : index
    %c0_22 = arith.constant 0 : index
    %45 = vector.load %arg4[%c0_20, %c0_21, %c0_22] : memref<1x16x1xf32, #tpu.memory_space<vmem>>, vector<1x16x1xf32>
    %46 = vector.shape_cast %45 : vector<1x16x1xf32> to vector<16x1xf32>
    %47 = vector.shape_cast %23 : vector<16x1xf32> to vector<1x16x1xf32>
    tpu.vector_store %arg4[%c0_20, %c0_21, %c0_22], %47 {strides = array<i32>} : memref<1x16x1xf32, #tpu.memory_space<vmem>>, vector<1x16x1xf32>,
    %c0_23 = arith.constant 0 : index
    %c0_24 = arith.constant 0 : index
    %c0_25 = arith.constant 0 : index
    %48 = vector.load %arg5[%c0_23, %c0_24, %c0_25] : memref<1x1x384xf32, #tpu.memory_space<vmem>>, vector<1x1x384xf32>
    %49 = vector.shape_cast %48 : vector<1x1x384xf32> to vector<1x384xf32>
    %50 = vector.shape_cast %27 : vector<1x384xf32> to vector<1x1x384xf32>
    tpu.vector_store %arg5[%c0_23, %c0_24, %c0_25], %50 {strides = array<i32>} : memref<1x1x384xf32, #tpu.memory_space<vmem>>, vector<1x1x384xf32>,
    %c0_26 = arith.constant 0 : index
    %c0_27 = arith.constant 0 : index
    %c0_28 = arith.constant 0 : index
    %51 = vector.load %arg6[%c0_26, %c0_27, %c0_28] : memref<1x1x8xf32, #tpu.memory_space<vmem>>, vector<1x1x8xf32>
    %52 = vector.shape_cast %51 : vector<1x1x8xf32> to vector<1x8xf32>
    %53 = vector.shape_cast %43 : vector<1x8xf32> to vector<1x1x8xf32>
    tpu.vector_store %arg6[%c0_26, %c0_27, %c0_28], %53 {strides = array<i32>} : memref<1x1x8xf32, #tpu.memory_space<vmem>>, vector<1x1x8xf32>,
    %c0_29 = arith.constant 0 : index
    %c0_30 = arith.constant 0 : index
    %c0_31 = arith.constant 0 : index
    %54 = vector.load %arg7[%c0_29, %c0_30, %c0_31] : memref<1x1x384xf32, #tpu.memory_space<vmem>>, vector<1x1x384xf32>
    %55 = vector.shape_cast %54 : vector<1x1x384xf32> to vector<1x384xf32>
    %56 = vector.shape_cast %44 : vector<1x384xf32> to vector<1x1x384xf32>
    tpu.vector_store %arg7[%c0_29, %c0_30, %c0_31], %56 {strides = array<i32>} : memref<1x1x384xf32, #tpu.memory_space<vmem>>, vector<1x1x384xf32>,
    return
  }
  func.func @transform_0(%arg0: i32) -> (i32, i32, i32) {
    %c0_i32 = arith.constant 0 : i32
    %c0_i32_0 = arith.constant 0 : i32
    %c0_i32_1 = arith.constant 0 : i32
    return %arg0, %c0_i32, %c0_i32_0 : i32, i32, i32
  }
  func.func @transform_1(%arg0: i32) -> (i32, i32, i32) {
    %c0_i32 = arith.constant 0 : i32
    %c0_i32_0 = arith.constant 0 : i32
    %c0_i32_1 = arith.constant 0 : i32
    return %arg0, %c0_i32, %c0_i32_0 : i32, i32, i32
  }
  func.func @transform_2(%arg0: i32) -> (i32, i32) {
    %c0_i32 = arith.constant 0 : i32
    %c0_i32_0 = arith.constant 0 : i32
    %c0_i32_1 = arith.constant 0 : i32
    return %c0_i32, %c0_i32_0 : i32, i32
  }
  func.func @transform_3(%arg0: i32) -> (i32, i32, i32) {
    %c0_i32 = arith.constant 0 : i32
    %c0_i32_0 = arith.constant 0 : i32
    %c0_i32_1 = arith.constant 0 : i32
    return %arg0, %c0_i32, %c0_i32_0 : i32, i32, i32
  }
  func.func @transform_4(%arg0: i32) -> (i32, i32, i32) {
    %c0_i32 = arith.constant 0 : i32
    %c0_i32_0 = arith.constant 0 : i32
    %c0_i32_1 = arith.constant 0 : i32
    return %arg0, %c0_i32, %c0_i32_0 : i32, i32, i32
  }
  func.func @transform_5(%arg0: i32) -> (i32, i32, i32) {
    %c0_i32 = arith.constant 0 : i32
    %c0_i32_0 = arith.constant 0 : i32
    %c0_i32_1 = arith.constant 0 : i32
    return %arg0, %c0_i32, %c0_i32_0 : i32, i32, i32
  }
  func.func @transform_6(%arg0: i32) -> (i32, i32, i32) {
    %c0_i32 = arith.constant 0 : i32
    %c0_i32_0 = arith.constant 0 : i32
    %c0_i32_1 = arith.constant 0 : i32
    return %arg0, %c0_i32, %c0_i32_0 : i32, i32, i32
  }
}

</mosaic_0001>

<bundles_post_ra>
// kernel: tpu_custom_call.1
= control target key start
LH: loop header
LB: loop body
LE: loop exit
PB: predicated region body
PF: predicated region fallthrough
CT: control target
= control target key end

     0   :  { %s2328_s0 = inlined_call_operand.hbm [shape: f32[2,16,384], index: 0, kind: input, shape index: {}]   ;;  %s2329_s1 = inlined_call_operand.hbm [shape: f32[2,8,384], index: 1, kind: input, shape index: {}]   ;;  %s2330_s2 = inlined_call_operand.hbm [shape: f32[384,384], index: 2, kind: input, shape index: {}]   ;;  %s2331_s3 = inlined_call_operand.vmem [shape: f32[2,16,1], index: 3, kind: output, shape index: {0}]   ;;  %s2332_s4 = inlined_call_operand.hbm [shape: f32[2,1,384], index: 4, kind: output, shape index: {1}]   ;;  %s2333_s5 = inlined_call_operand.hbm [shape: f32[2,1,8], index: 5, kind: output, shape index: {2}]   ;;  %s2334_s6 = inlined_call_operand.hbm [shape: f32[2,1,384], index: 6, kind: output, shape index: {3}]  }
   0x1   :  { %2343 = sst [smem:[#allocation19_spill]] %s2328_s0 }
   0x2   :  { %2344 = sst [smem:[#allocation20_spill]] %s2330_s2 }
   0x3   :  { %12 = vsyncpa [#allocation3], 0 }
   0x4   :  { %14 = vsyncpa [#allocation3 + $0x1], 0 }
   0x5   :  { %15 = vsyncpa [#allocation6], 0 }
   0x6   :  { %17 = vsyncpa [#allocation6 + $0x1], 0 }
   0x7   :  { %18 = vsyncpa [#allocation4], 0 }
   0x8   :  { %20 = vsyncpa [#allocation4 + $0x1], 0 }
   0x9   :  { %21 = vsyncpa [#allocation10], 0 }
   0xa   :  { %23 = vsyncpa [#allocation10 + $0x1], 0  ;;  %s1975_s21 = smov 0   ;;  %s1977_s22 = smov 0  }
   0xb   :  { %s1979_s23 = smov 0   ;;  %s1981_s24 = smov 0  }
   0xc LB: > { %2345 = sst [smem:[#allocation17_spill]] %s1923_s23  ;;  %s1996_s25 = sadd.s32 4294967295, %s1927_s24   ;;  %s1927_s24 = sphi %s1981_s24, %s2373_s24   ;;  %s1923_s23 = sphi %s1979_s23, %s2370_s23   ;;  %s1919_s22 = sphi %s1977_s22, %s2372_s22   ;;  %s1915_s21 = sphi %s1975_s21, %s2371_s21  }
   0xd   : > { %s2335_s26 = sadd.s32 4294967294, %s1927_s24   ;;  %p49_p0 = scmp.ne.s32.totalorder %s1919_s22, %s1915_s21 }
   0xe   : > { %p2338_p1 = scmp.eq.s32.totalorder %s1996_s25, 0  ;;  %p152_p3 = scmp.eq.s32.totalorder %s2335_s26, 1 }
   0xf   : > { %p1494_p5 = scmp.ge.s32.totalorder %s1927_s24, 1  ;;  %p211_p7 = scmp.lt.s32.totalorder %s1927_s24, 3 }
  0x10   : > { %p2007_p4 = por %p2338_p1, %p49_p0  ;;  %p2012_p6 = por %p152_p3, %p49_p0 }
  0x11   : > { %p2017_p8 = pnand %p1494_p5, %p211_p7  ;;  %s1929_s30 = smov [#allocation7]  }
  0x12   : > { %s2346_s27 = scalar_select %p2007_p4, 1, 0 }
  0x13   : > { %s2347_s28 = scalar_select %p2012_p6, 1, 0 }
  0x14   : > { %s2348_s29 = scalar_select %p2017_p8, 1, 0 }
  0x15   : > { %s223_s7 = sshll.u32 %s1929_s30, 4  ;;  %p1640_p9 = pneg %p2017_p8  ;;  %s224_s7 = int_to_ptr.vmem [resolvable:$true] %s223_s7 }
  0x16   : > { %s2031_s9 = sadd.s32 1, %s1927_s24   ;;  %s36_s10 = sadd.s32 1, %s1923_s23 }
  0x17   : > { %p2026_p11 = pnand %p1640_p9, %p2338_p1  ;;  %s33_s11 = ssub.s32 %s1927_s24, %s2031_s9 }
  0x18   : > { %s1728_s12 = scalar_lea.vmem %s224_s7, 18432  ;;  %p1736_p5 = scmp.lt.s32.totalorder %s224_s7, %s224_s7 }
  0x19   : > { %p1719_p12 = pneg %p2026_p11  ;;  %p1729_p13 = scmp.ne.s32.totalorder %s224_s7, %s1728_s12 }
  0x1a   : > { %p1737_p7 = scmp.lt.s32.totalorder %s1728_s12, %s1728_s12 }
  0x1b   : > { %p1731_p0 = pnand %p1729_p13, %p1719_p12 }
  0x1c   : > { %p1738_p10 = por %p1737_p7, %p1736_p5 }
  0x1d   : > { %p1732_p3 = pneg %p1731_p0 }
  0x1f   : > { %p1739_p2 = pnand %p1738_p10, %p1732_p3 }
  0x21   : > { %1742 = shalt.err (!%p1739_p2)
}
  0x22   : > { %s2336_s13 = smov 384   ;;  %s2337_s14 = smov 24  }
  0x23   : > { %s2350_s2 = sld [smem:[#allocation20_spill]]  ;;  %p34_p2 = scmp.eq.s32.totalorder %s33_s11, 0 }
  0x24   : > { %p43_p9 = scmp.ne.s32.totalorder %s1923_s23, %s1919_s22  ;;  %p44_p10 = scmp.eq.s32.totalorder %s1927_s24, 0 }
  0x25   : > { %p1662_p12 = scmp.lt.s32.totalorder %s1927_s24, 2  ;;  %p2352_p0 = scmp.eq.s32.totalorder %s1996_s25, 1 }
  0x26   : > { %s2051_s17 = scalar_select %p34_p2, %s1923_s23, %s36_s10  }
  0x27   : > { %p45_p13 = por %p44_p10, %p43_p9  ;;  %p2055_p3 = por %p2352_p0, %p43_p9 }
  0x28   : > { %2351 = sst [smem:[#allocation18_spill]] %s2051_s17  ;;  %s2060_s19 = sand.u32 1, %s1923_s23  }
  0x29   : > { %1643 = dma.hbm_to_vmem [thread:$0]  (!%p2026_p11), %s2350_s2, 18432, %s224_s7, [#allocation6], %s2336_s13, %s2336_s13, %s2337_s14  }
  0x2a   : > { %s2353_s18 = scalar_select %p2055_p3, 1, 0 }
  0x2b   : > { %s1618_s20 = smul.u32 768, %s1927_s24  ;;  %p2064_p11 = pnand %p1662_p12, %p45_p13 }
  0x2c   : > { %s1617_s30 = smul.u32 48, %s2060_s19  ;;  %s2355_s0 = sld [smem:[#allocation19_spill]] }
  0x2d   : > { %s238_s26 = scalar_lea.sflag [#allocation3], %s2060_s19  ;;  %p1745_p7 = pneg %p2064_p11 }
  0x2e   : > { %s241_s12 = scalar_lea.vmem [#allocation2], %s1617_s30 }
  0x2f   : > { %s248_s15 = sshll.u32 %s241_s12, 4  ;;  %s2073_s15 = int_to_ptr.vmem [resolvable:$true] %s248_s15 }
  0x32   : > { %s2071_s10 = scalar_lea.hbm %s2355_s0, %s1618_s20  ;;  %s1748_s11 = scalar_lea.hbm %s2355_s0, 1536 }
  0x33   : > { %s1743_s13 = scalar_lea.hbm %s2071_s10, 768  ;;  %p1749_p10 = scmp.lt.s32.totalorder %s2071_s10, %s2355_s0 }
  0x34   : > { %p1744_p5 = scmp.ne.s32.totalorder %s2071_s10, %s1743_s13  ;;  %p1750_p12 = scmp.lt.s32.totalorder %s1748_s11, %s1743_s13 }
  0x36   : > { %p1746_p2 = pnand %p1745_p7, %p1744_p5  ;;  %p1751_p13 = por %p1750_p12, %p1749_p10 }
  0x38   : > { %p1747_p9 = pneg %p1746_p2 }
  0x3a   : > { %p1752_p0 = pnand %p1751_p13, %p1747_p9 }
  0x3c   : > { %1755 = shalt.err (!%p1752_p0)
}
  0x3d   : > { %s1756_s30 = scalar_lea.vmem %s2073_s15, 768  ;;  %s1932_s12 = smov [#allocation2]  }
  0x3e   : > { %p1757_p1 = scmp.ne.s32.totalorder %s2073_s15, %s1756_s30  ;;  %s1761_s8 = sshll.u32 %s1932_s12, 4  ;;  %s1762_s8 = int_to_ptr.vmem [resolvable:$false] %s1761_s8 }
  0x3f   : > { %s1763_s20 = scalar_lea.vmem %s1762_s8, 1536  ;;  %p1764_p6 = scmp.lt.s32.totalorder %s2073_s15, %s1762_s8 }
  0x40   : > { %p1759_p5 = pnand %p1757_p1, %p1745_p7  ;;  %p1765_p3 = scmp.lt.s32.totalorder %s1763_s20, %s1756_s30 }
  0x42   : > { %p1760_p2 = pneg %p1759_p5  ;;  %p1766_p4 = por %p1765_p3, %p1764_p6 }
  0x44   : > { %p1767_p10 = pnand %p1766_p4, %p1760_p2 }
  0x46   : > { %1770 = shalt.err (!%p1767_p10)
}
  0x47   : > { %s2356_s2 = smov 24   ;;  %s2357_s13 = smov 384  }
  0x48   : > { %1647 = dma.hbm_to_vmem [thread:$0]  (!%p2064_p11), %s2071_s10, 768, %s2073_s15, %s238_s26, %s2357_s13, %s2357_s13, %s2356_s2  }
  0x49   : > { %s1619_s14 = smul.u32 24, %s2060_s19  ;;  %s2358_s0 = sand.u32 1, %s1927_s24  }
  0x4a   : > { %s1620_s11 = smul.u32 384, %s1927_s24  ;;  %s259_s17 = scalar_lea.sflag [#allocation6], %s2358_s0 }
  0x4b   : > { %s262_s20 = scalar_lea.vmem [#allocation5], %s1619_s14  ;;  %s1776_s10 = scalar_lea.hbm %s2329_s1, 768 }
  0x4c   : > { %s2111_s8 = scalar_lea.hbm %s2329_s1, %s1620_s11  ;;  %s270_s16 = sshll.u32 %s262_s20, 4  ;;  %s271_s16 = int_to_ptr.vmem [resolvable:$true] %s270_s16 }
  0x4d   : > { %s1771_s23 = scalar_lea.hbm %s2111_s8, 384  ;;  %p1777_p3 = scmp.lt.s32.totalorder %s2111_s8, %s2329_s1 }
  0x4e   : > { %p1772_p1 = scmp.ne.s32.totalorder %s2111_s8, %s1771_s23  ;;  %p1778_p9 = scmp.lt.s32.totalorder %s1776_s10, %s1771_s23 }
  0x50   : > { %p1774_p4 = pnand %p1772_p1, %p1745_p7  ;;  %p1779_p12 = por %p1778_p9, %p1777_p3 }
  0x52   : > { %p1775_p6 = pneg %p1774_p4 }
  0x54   : > { %p1780_p13 = pnand %p1779_p12, %p1775_p6 }
  0x56   : > { %1783 = shalt.err (!%p1780_p13)
}
  0x57   : > { %s1784_s13 = scalar_lea.vmem %s271_s16, 384  ;;  %s1933_s0 = smov [#allocation5]  }
  0x58   : > { %p1785_p0 = scmp.ne.s32.totalorder %s271_s16, %s1784_s13  ;;  %s1789_s14 = sshll.u32 %s1933_s0, 4  ;;  %s1790_s14 = int_to_ptr.vmem [resolvable:$false] %s1789_s14 }
  0x59   : > { %s1791_s11 = scalar_lea.vmem %s1790_s14, 768  ;;  %p1792_p10 = scmp.lt.s32.totalorder %s271_s16, %s1790_s14 }
  0x5a   : > { %p1787_p5 = pnand %p1785_p0, %p1745_p7  ;;  %p1793_p1 = scmp.lt.s32.totalorder %s1791_s11, %s1784_s13 }
  0x5c   : > { %p1788_p2 = pneg %p1787_p5  ;;  %p1794_p4 = por %p1793_p1, %p1792_p10 }
  0x5e   : > { %p1795_p8 = pnand %p1794_p4, %p1788_p2 }
  0x60   : > { %1798 = shalt.err (!%p1795_p8)
}
  0x61   : > { %1650 = dma.hbm_to_vmem [thread:$0]  (!%p2064_p11), %s2111_s8, 384, %s271_s16, %s259_s17  }
  0x62   : > { %p2359_p6 = scmp.ne.s32.totalorder %s2348_s29, 0 }
  0x63   : > { %s2136_s23 = sand.u32 (!%p2359_p6), 1, %s1919_s22   ;;  %p2360_p7 = scmp.ne.s32.totalorder (!%p2359_p6), %s2346_s27, 0 }
  0x64   : > { %279 = sbr.rel (%p2359_p6) target bundleno = 1164 (0x48c), region = 32  ;;  %s282_s12 = scalar_lea.sflag (!%p2359_p6), [#allocation3], %s2136_s23 }
  0x65   : > { %s1621_s30 = smul.u32 (!%p2359_p6), 48, %s2136_s23 }
  0x67   : > { %s2140_s20 = scalar_lea.vmem (!%p2359_p6), [#allocation2], %s1621_s30 }
  0x69   : > { %1894 = dma.done.wait (%p2360_p7), %s282_s12, 768  }
  0x6a   : > { %1896 = vsyncadd (%p2360_p7), %s282_s12, 4294966528  ;;  %s290_s29 = sand.u32 1, %s1996_s25   ;;  %s1622_s17 = smul.u32 24, %s2136_s23 }
  0x6b   : > { %s291_s7 = scalar_lea.sflag [#allocation6], %s290_s29 }
  0x6c   : > { %s2150_s16 = scalar_lea.vmem [#allocation5], %s1622_s17 }
  0x6d   : > { %1898 = dma.done.wait (%p2360_p7), %s291_s7, 384  }
  0x6e   : > { %1900 = vsyncadd (%p2360_p7), %s291_s7, 4294966912  ;;  %p2361_p8 = scmp.eq.s32.totalorder %s1996_s25, 0 }
  0x70   : > { %1902 = dma.done.wait (%p2361_p8), [#allocation6], 18432   ;;  %p2362_p11 = pmov %p2361_p8 }
  0x71   : > { %v1934_v0 = vmov 0.0   ;;  %v406_v1 = vld [vmem:[#allocation7 + $0x170] sm:$0xff]  ;;  %v405_v2 = vld [vmem:[#allocation7 + $0x168] sm:$0xff]  ;;  %v403_v3 = vld [vmem:[#allocation7 + $0x158] sm:$0xff]  ;;  %vm960_vm0 = vcmask 64512   ;;  %p346_p3 = scmp.lt.s32.totalorder %s1996_s25, 1 }
  0x72   : > { %1904 = vsyncadd (%p2362_p11), [#allocation6], 4294948864  ;;  %645 = vmatprep.mubr.f32.mxu1 %v1934_v0  ;;  %504 = vmatprep.subr.mxu0 %v406_v1  ;;  %v402_v4 = vld [vmem:[#allocation7 + $0x150] sm:$0xff]  ;;  %v400_v5 = vld [vmem:[#allocation7 + $0x140] sm:$0xff]  ;;  %vm1185_vm4 = vcmask 7168   ;;  %s1623_s15 = smul.u32 3, %s2136_s23 }
  0x73   : > { %505 = vmatpush1.msra.mxu0 %v405_v2  ;;  %v399_v6 = vld [vmem:[#allocation7 + $0x138] sm:$0xff]  ;;  %v397_v7 = vld [vmem:[#allocation7 + $0x128] sm:$0xff]  ;;  %v396_v8 = vld [vmem:[#allocation7 + $0x120] sm:$0xff]  ;;  %s347_s27 = scalar_select %p346_p3, %s1996_s25, 1  ;;  %vm1220_vm6 = vcmask 57344   ;;  %vm1936_vm7 = vmmov 0  }
  0x74   : > { %506 = vmatprep.subr.mxu0 %v403_v3  ;;  %v394_v9 = vld [vmem:[#allocation7 + $0x110] sm:$0xff]  ;;  %v393_v10 = vld [vmem:[#allocation7 + $0x108] sm:$0xff]  ;;  %v391_v11 = vld [vmem:[#allocation7 + $0xf8] sm:$0xff]  ;;  %s2231_s2 = scalar_lea.vmem [#allocation8], %s1623_s15  ;;  %s338_s13 = scalar_lea.vmem [#allocation9], %s2136_s23 }
  0x75   : > { %507 = vmatpush1.msra.mxu0 %v402_v4  ;;  %v502_v12 = vld [vmem:[#allocation7 + $0x470] sm:$0xff]  ;;  %v501_v14 = vld [vmem:[#allocation7 + $0x468] sm:$0xff]  ;;  %v499_v15 = vld [vmem:[#allocation7 + $0x458] sm:$0xff]  ;;  %s1510_s8 = sshll.u32 %s347_s27, 4  ;;  %s1506_s0 = sshll.u32 %s1996_s25, 4 }
  0x76   : > { %508 = vmatprep.subr.mxu0 %v400_v5  ;;  %v390_v13 = vld [vmem:[#allocation7 + $0xf0] sm:$0xff]  ;;  %581 = vmatprep.subr.mxu1 %v502_v12  ;;  %v388_v16 = vld [vmem:[#allocation7 + $0xe0] sm:$0xff]  ;;  %v387_v18 = vld [vmem:[#allocation7 + $0xd8] sm:$0xff]  ;;  %s350_s10 = scalar_lea.vmem %s2331_s3, %s1510_s8  ;;  %s1293_s30 = scalar_lea.hbm %s2333_s5, %s1506_s0 }
  0x77   : > { %509 = vmatpush1.msra.mxu0 %v399_v6  ;;  %582 = vmatpush1.msra.mxu1 %v501_v14  ;;  %v498_v17 = vld [vmem:[#allocation7 + $0x450] sm:$0xff]  ;;  %v496_v19 = vld [vmem:[#allocation7 + $0x440] sm:$0xff]  ;;  %v495_v20 = vld [vmem:[#allocation7 + $0x438] sm:$0xff]  ;;  %s1295_s12 = sshll.u32 %s338_s13, 4  ;;  %p2365_p12 = scmp.ne.s32.totalorder %s2353_s18, 0  ;;  %s1296_s12 = int_to_ptr.vmem [resolvable:$true] %s1295_s12 }
  0x78   : > { %510 = vmatprep.subr.mxu0 %v397_v7  ;;  %583 = vmatprep.subr.mxu1 %v499_v15  ;;  %v385_v21 = vld [vmem:[#allocation7 + $0xc8] sm:$0xff]  ;;  %v384_v23 = vld [vmem:[#allocation7 + $0xc0] sm:$0xff]  ;;  %v382_v25 = vld [vmem:[#allocation7 + $0xb0] sm:$0xff]  ;;  %s1799_s17 = scalar_lea.vmem %s1296_s12, 16  ;;  %s1937_s7 = smov [#allocation9]  }
  0x79   : > { %511 = vmatpush1.msra.mxu0 %v396_v8  ;;  %584 = vmatpush1.msra.mxu1 %v498_v17  ;;  %v493_v22 = vld [vmem:[#allocation7 + $0x428] sm:$0xff]  ;;  %v492_v24 = vld [vmem:[#allocation7 + $0x420] sm:$0xff]  ;;  %v490_v26 = vld [vmem:[#allocation7 + $0x410] sm:$0xff]  ;;  %p1800_p9 = scmp.ne.s32.totalorder %s1296_s12, %s1799_s17 }
  0x7a   : > { %512 = vmatprep.subr.mxu0 %v394_v9  ;;  %585 = vmatprep.subr.mxu1 %v496_v19  ;;  %v381_v27 = vld [vmem:[#allocation7 + $0xa8] sm:$0xff]  ;;  %v379_v29 = vld [vmem:[#allocation7 + $0x98] sm:$0xff]  ;;  %v378_v31 = vld [vmem:[#allocation7 + $0x90] sm:$0xff] }
  0x7b   : > { %513 = vmatpush1.msra.mxu0 %v393_v10  ;;  %586 = vmatpush1.msra.mxu1 %v495_v20  ;;  %v489_v28 = vld [vmem:[#allocation7 + $0x408] sm:$0xff]  ;;  %v487_v30 = vld [vmem:[#allocation7 + $0x3f8] sm:$0xff]  ;;  %v486_v32 = vld [vmem:[#allocation7 + $0x3f0] sm:$0xff]  ;;  %p1801_p13 = pnand %p1800_p9, %p2365_p12 }
  0x7c   : > { %514 = vmatprep.subr.mxu0 %v391_v11  ;;  %587 = vmatprep.subr.mxu1 %v493_v22  ;;  %v376_v33 = vld [vmem:[#allocation7 + $0x80] sm:$0xff]  ;;  %v375_v35 = vld [vmem:[#allocation7 + $0x78] sm:$0xff]  ;;  %v373_v37 = vld [vmem:[#allocation7 + $0x68] sm:$0xff] }
  0x7d   : > { %515 = vmatpush1.msra.mxu0 %v390_v13  ;;  %588 = vmatpush1.msra.mxu1 %v492_v24  ;;  %v484_v34 = vld [vmem:[#allocation7 + $0x3e0] sm:$0xff]  ;;  %v483_v36 = vld [vmem:[#allocation7 + $0x3d8] sm:$0xff]  ;;  %v481_v38 = vld [vmem:[#allocation7 + $0x3c8] sm:$0xff]  ;;  %p1802_p0 = pneg %p1801_p13 }
  0x7e   : > { %516 = vmatprep.subr.mxu0 %v388_v16  ;;  %589 = vmatprep.subr.mxu1 %v490_v26  ;;  %v372_v39 = vld [vmem:[#allocation7 + $0x60] sm:$0xff]  ;;  %v370_v41 = vld [vmem:[#allocation7 + $0x50] sm:$0xff]  ;;  %v369_v43 = vld [vmem:[#allocation7 + $0x48] sm:$0xff] }
  0x7f   : > { %517 = vmatpush1.msra.mxu0 %v387_v18  ;;  %590 = vmatpush1.msra.mxu1 %v489_v28  ;;  %v480_v40 = vld [vmem:[#allocation7 + $0x3c0] sm:$0xff]  ;;  %v478_v42 = vld [vmem:[#allocation7 + $0x3b0] sm:$0xff]  ;;  %v477_v44 = vld [vmem:[#allocation7 + $0x3a8] sm:$0xff] }
  0x80   : > { %518 = vmatprep.subr.mxu0 %v385_v21  ;;  %591 = vmatprep.subr.mxu1 %v487_v30  ;;  %v367_v45 = vld [vmem:[#allocation7 + $0x38] sm:$0xff]  ;;  %v366_v47 = vld [vmem:[#allocation7 + $0x30] sm:$0xff]  ;;  %v364_v49 = vld [vmem:[#allocation7 + $0x20] sm:$0xff] }
  0x81   : > { %519 = vmatpush1.msra.mxu0 %v384_v23  ;;  %592 = vmatpush1.msra.mxu1 %v486_v32  ;;  %v475_v46 = vld [vmem:[#allocation7 + $0x398] sm:$0xff]  ;;  %v474_v48 = vld [vmem:[#allocation7 + $0x390] sm:$0xff]  ;;  %v472_v50 = vld [vmem:[#allocation7 + $0x380] sm:$0xff] }
  0x82   : > { %520 = vmatprep.subr.mxu0 %v382_v25  ;;  %593 = vmatprep.subr.mxu1 %v484_v34  ;;  %v363_v51 = vld [vmem:[#allocation7 + $0x18] sm:$0xff]  ;;  %v361_v53 = vld [vmem:[#allocation7 + $0x8] sm:$0xff]  ;;  %v360_v55 = vld [vmem:[#allocation7] sm:$0xff] }
  0x83   : > { %521 = vmatpush1.msra.mxu0 %v381_v27  ;;  %594 = vmatpush1.msra.mxu1 %v483_v36  ;;  %v471_v52 = vld [vmem:[#allocation7 + $0x378] sm:$0xff]  ;;  %v469_v54 = vld [vmem:[#allocation7 + $0x368] sm:$0xff]  ;;  %v468_v56 = vld [vmem:[#allocation7 + $0x360] sm:$0xff] }
  0x84   : > { %522 = vmatprep.subr.mxu0 %v379_v29  ;;  %595 = vmatprep.subr.mxu1 %v481_v38  ;;  %v454_v57 = vld [vmem:[#allocation7 + $0x2f0] sm:$0xff]  ;;  %v453_v59 = vld [vmem:[#allocation7 + $0x2e8] sm:$0xff]  ;;  %v451_v61 = vld [vmem:[#allocation7 + $0x2d8] sm:$0xff] }
  0x85   : > { %523 = vmatpush1.msra.mxu0 %v378_v31  ;;  %596 = vmatpush1.msra.mxu1 %v480_v40  ;;  %v466_v58 = vld [vmem:[#allocation7 + $0x350] sm:$0xff]  ;;  %v465_v60 = vld [vmem:[#allocation7 + $0x348] sm:$0xff]  ;;  %v463_v62 = vld [vmem:[#allocation7 + $0x338] sm:$0xff] }
  0x86   : > { %524 = vmatprep.subr.mxu0 %v376_v33  ;;  %597 = vmatprep.subr.mxu1 %v478_v42  ;;  %v450_v63 = vld [vmem:[#allocation7 + $0x2d0] sm:$0xff]  ;;  %v448_v2 = vld [vmem:[#allocation7 + $0x2c0] sm:$0xff]  ;;  %v447_v4 = vld [vmem:[#allocation7 + $0x2b8] sm:$0xff] }
  0x87   : > { %525 = vmatpush1.msra.mxu0 %v375_v35  ;;  %598 = vmatpush1.msra.mxu1 %v477_v44  ;;  %v462_v1 = vld [vmem:[#allocation7 + $0x330] sm:$0xff]  ;;  %v460_v3 = vld [vmem:[#allocation7 + $0x320] sm:$0xff]  ;;  %v459_v5 = vld [vmem:[#allocation7 + $0x318] sm:$0xff] }
  0x88   : > { %526 = vmatprep.subr.mxu0 %v373_v37  ;;  %599 = vmatprep.subr.mxu1 %v475_v46  ;;  %v445_v6 = vld [vmem:[#allocation7 + $0x2a8] sm:$0xff]  ;;  %v444_v8 = vld [vmem:[#allocation7 + $0x2a0] sm:$0xff]  ;;  %v442_v10 = vld [vmem:[#allocation7 + $0x290] sm:$0xff] }
  0x89   : > { %527 = vmatpush1.msra.mxu0 %v372_v39  ;;  %600 = vmatpush1.msra.mxu1 %v474_v48  ;;  %v457_v7 = vld [vmem:[#allocation7 + $0x308] sm:$0xff]  ;;  %v456_v9 = vld [vmem:[#allocation7 + $0x300] sm:$0xff]  ;;  %v455_v11 = vld [vmem:[#allocation7 + $0x2f8] sm:$0xff] }
  0x8a   : > { %528 = vmatprep.subr.mxu0 %v370_v41  ;;  %601 = vmatprep.subr.mxu1 %v472_v50  ;;  %v441_v12 = vld [vmem:[#allocation7 + $0x288] sm:$0xff]  ;;  %v2162_v13 = vld [vmem:[%s2140_s20 + $0x10] sm:$0xff]  ;;  %v439_v14 = vld [vmem:[#allocation7 + $0x278] sm:$0xff] }
  0x8b   : > { %529 = vmatpush1.msra.mxu0 %v369_v43  ;;  %602 = vmatpush1.msra.mxu1 %v471_v52  ;;  %v407_v15 = vld [vmem:[#allocation7 + $0x178] sm:$0xff]  ;;  %v438_v16 = vld [vmem:[#allocation7 + $0x270] sm:$0xff]  ;;  %v452_v17 = vld [vmem:[#allocation7 + $0x2e0] sm:$0xff] }
  0x8c   : > { %530 = vmatprep.subr.mxu0 %v367_v45  ;;  %603 = vmatprep.subr.mxu1 %v469_v54  ;;  %v436_v18 = vld [vmem:[#allocation7 + $0x260] sm:$0xff]  ;;  %v435_v20 = vld [vmem:[#allocation7 + $0x258] sm:$0xff]  ;;  %v449_v21 = vld [vmem:[#allocation7 + $0x2c8] sm:$0xff] }
  0x8d   : > { %531 = vmatpush1.msra.mxu0 %v366_v47  ;;  %604 = vmatpush1.msra.mxu1 %v468_v56  ;;  %v404_v19 = vld [vmem:[#allocation7 + $0x160] sm:$0xff]  ;;  %v433_v22 = vld [vmem:[#allocation7 + $0x248] sm:$0xff]  ;;  %v446_v25 = vld [vmem:[#allocation7 + $0x2b0] sm:$0xff] }
  0x8e   : > { %532 = vmatprep.subr.mxu0 %v364_v49  ;;  %605 = vmatprep.subr.mxu1 %v466_v58  ;;  %v401_v23 = vld [vmem:[#allocation7 + $0x148] sm:$0xff]  ;;  %v432_v24 = vld [vmem:[#allocation7 + $0x240] sm:$0xff]  ;;  %v430_v26 = vld [vmem:[#allocation7 + $0x230] sm:$0xff] }
  0x8f   : > { %533 = vmatpush1.msra.mxu0 %v363_v51  ;;  %606 = vmatpush1.msra.mxu1 %v465_v60  ;;  %v2166_v27 = vld [vmem:[%s2140_s20 + $0x8] sm:$0xff]  ;;  %v398_v29 = vld [vmem:[#allocation7 + $0x130] sm:$0xff]  ;;  %v424_v34 = vld [vmem:[#allocation7 + $0x200] sm:$0xff] }
  0x90   : > { %534 = vmatprep.subr.mxu0 %v361_v53  ;;  %607 = vmatprep.subr.mxu1 %v463_v62  ;;  %v429_v28 = vld [vmem:[#allocation7 + $0x228] sm:$0xff]  ;;  %v427_v30 = vld [vmem:[#allocation7 + $0x218] sm:$0xff]  ;;  %v426_v32 = vld [vmem:[#allocation7 + $0x210] sm:$0xff] }
  0x91   : > { %535 = vmatpush1.msra.mxu0 %v360_v55  ;;  %608 = vmatpush1.msra.mxu1 %v462_v1  ;;  %v443_v31 = vld [vmem:[#allocation7 + $0x298] sm:$0xff]  ;;  %v440_v35 = vld [vmem:[#allocation7 + $0x280] sm:$0xff]  ;;  %v421_v38 = vld [vmem:[#allocation7 + $0x1e8] sm:$0xff] }
  0x92   : > { %536 = vmatprep.subr.mxu0 %v454_v57  ;;  %609 = vmatprep.subr.mxu1 %v460_v3  ;;  %v395_v33 = vld [vmem:[#allocation7 + $0x118] sm:$0xff]  ;;  %v392_v37 = vld [vmem:[#allocation7 + $0x100] sm:$0xff]  ;;  %v437_v39 = vld [vmem:[#allocation7 + $0x268] sm:$0xff] }
  0x93   : > { %537 = vmatpush2.msra.mxu0 %v453_v59  ;;  %610 = vmatpush1.msra.mxu1 %v459_v5  ;;  %v423_v36 = vld [vmem:[#allocation7 + $0x1f8] sm:$0xff]  ;;  %v420_v40 = vld [vmem:[#allocation7 + $0x1e0] sm:$0xff]  ;;  %v389_v41 = vld [vmem:[#allocation7 + $0xe8] sm:$0xff] }
  0x94   : > { %538 = vmatprep.subr.mxu0 %v451_v61  ;;  %611 = vmatprep.subr.mxu1 %v457_v7  ;;  %v418_v42 = vld [vmem:[#allocation7 + $0x1d0] sm:$0xff]  ;;  %v417_v44 = vld [vmem:[#allocation7 + $0x1c8] sm:$0xff]  ;;  %v415_v46 = vld [vmem:[#allocation7 + $0x1b8] sm:$0xff] }
  0x95   : > { %539 = vmatpush2.msra.mxu0 %v450_v63  ;;  %612 = vmatpush1.msra.mxu1 %v456_v9  ;;  %v434_v43 = vld [vmem:[#allocation7 + $0x250] sm:$0xff]  ;;  %v431_v47 = vld [vmem:[#allocation7 + $0x238] sm:$0xff]  ;;  %v412_v50 = vld [vmem:[#allocation7 + $0x1a0] sm:$0xff] }
  0x96   : > { %540 = vmatprep.subr.mxu0 %v448_v2  ;;  %1511 = vmatprep.subr.mxu1 %v455_v11  ;;  %v386_v45 = vld [vmem:[#allocation7 + $0xd0] sm:$0xff]  ;;  %v383_v49 = vld [vmem:[#allocation7 + $0xb8] sm:$0xff]  ;;  %v428_v51 = vld [vmem:[#allocation7 + $0x220] sm:$0xff] }
  0x97   : > { %541 = vmatpush2.msra.mxu0 %v447_v4  ;;  %646 = vmatmul.mubr.f32.vlgmr.msra.gmra.mxu1 %v2162_v13  ;;  %v414_v48 = vld [vmem:[#allocation7 + $0x1b0] sm:$0xff]  ;;  %v411_v52 = vld [vmem:[#allocation7 + $0x198] sm:$0xff]  ;;  %v380_v53 = vld [vmem:[#allocation7 + $0xa0] sm:$0xff] }
  0x98   : > { %542 = vmatprep.subr.mxu0 %v445_v6  ;;  %1512 = vmatpush3.msra.mxu1 %v407_v15  ;;  %v409_v54 = vld [vmem:[#allocation7 + $0x188] sm:$0xff]  ;;  %v408_v56 = vld [vmem:[#allocation7 + $0x180] sm:$0xff]  ;;  %v503_v59 = vld [vmem:[#allocation7 + $0x478] sm:$0xff] }
  0x99   : > { %543 = vmatpush2.msra.mxu0 %v444_v8  ;;  %1513 = vmatprep.subr.mxu1 %v452_v17  ;;  %v425_v55 = vld [vmem:[#allocation7 + $0x208] sm:$0xff]  ;;  %v2170_v58 = vld [vmem:[%s2140_s20] sm:$0xff]  ;;  %v419_v63 = vld [vmem:[#allocation7 + $0x1d8] sm:$0xff] }
  0x9a   : > { %544 = vmatprep.subr.mxu0 %v442_v10  ;;  %1514 = vmatpush3.msra.mxu1 %v404_v19  ;;  %v377_v57 = vld [vmem:[#allocation7 + $0x88] sm:$0xff]  ;;  %v422_v60 = vld [vmem:[#allocation7 + $0x1f0] sm:$0xff]  ;;  %v500_v61 = vld [vmem:[#allocation7 + $0x460] sm:$0xff] }
  0x9b   : > { %545 = vmatpush2.msra.mxu0 %v441_v12  ;;  %1515 = vmatprep.subr.mxu1 %v449_v21  ;;  %v374_v62 = vld [vmem:[#allocation7 + $0x70] sm:$0xff]  ;;  %v497_v1 = vld [vmem:[#allocation7 + $0x448] sm:$0xff]  ;;  %v371_v4 = vld [vmem:[#allocation7 + $0x58] sm:$0xff] }
  0x9c   : > { %546 = vmatprep.subr.mxu0 %v439_v14  ;;  %1516 = vmatpush3.msra.mxu1 %v401_v23  ;;  %v2174_v2 = vld [vmem:[%s2140_s20 + $0x20] sm:$0xff]  ;;  %v2178_v5 = vld [vmem:[%s2140_s20 + $0x28] sm:$0xff]  ;;  %v2182_v7 = vld [vmem:[%s2140_s20 + $0x18] sm:$0xff]  ;;  %s2248_s20 = scalar_lea.sflag [#allocation10], %s290_s29 }
  0x9d   : > { %547 = vmatpush2.msra.mxu0 %v438_v16  ;;  %1517 = vmatprep.subr.mxu1 %v446_v25  ;;  %v494_v3 = vld [vmem:[#allocation7 + $0x430] sm:$0xff]  ;;  %v491_v6 = vld [vmem:[#allocation7 + $0x418] sm:$0xff]  ;;  %v416_v8 = vld [vmem:[#allocation7 + $0x1c0] sm:$0xff] }
  0x9e   : > { %548 = vmatprep.subr.mxu0 %v436_v18  ;;  %568 = vmatprep.mubr.f32.mxu0 %v2166_v27  ;;  %v488_v9 = vld [vmem:[#allocation7 + $0x400] sm:$0xff]  ;;  %v413_v11 = vld [vmem:[#allocation7 + $0x1a8] sm:$0xff]  ;;  %v410_v15 = vld [vmem:[#allocation7 + $0x190] sm:$0xff] }
  0x9f   : > { %549 = vmatpush2.msra.mxu0 %v435_v20  ;;  %1518 = vmatpush3.msra.mxu1 %v398_v29  ;;  %v368_v10 = vld [vmem:[#allocation7 + $0x40] sm:$0xff]  ;;  %v485_v12 = vld [vmem:[#allocation7 + $0x3e8] sm:$0xff]  ;;  %v482_v16 = vld [vmem:[#allocation7 + $0x3d0] sm:$0xff] }
  0xa0   : > { %550 = vmatprep.subr.mxu0 %v433_v22  ;;  %1519 = vmatprep.subr.mxu1 %v443_v31  ;;  %v365_v14 = vld [vmem:[#allocation7 + $0x28] sm:$0xff]  ;;  %v362_v17 = vld [vmem:[#allocation7 + $0x10] sm:$0xff]  ;;  %v479_v18 = vld [vmem:[#allocation7 + $0x3b8] sm:$0xff] }
  0xa1   : > { %551 = vmatpush2.msra.mxu0 %v432_v24  ;;  %1520 = vmatpush3.msra.mxu1 %v395_v33  ;;  %v476_v19 = vld [vmem:[#allocation7 + $0x3a0] sm:$0xff]  ;;  %v473_v20 = vld [vmem:[#allocation7 + $0x388] sm:$0xff]  ;;  %v470_v21 = vld [vmem:[#allocation7 + $0x370] sm:$0xff] }
  0xa2   : > { %552 = vmatprep.subr.mxu0 %v430_v26  ;;  %1521 = vmatprep.subr.mxu1 %v440_v35  ;;  %v467_v22 = vld [vmem:[#allocation7 + $0x358] sm:$0xff]  ;;  %v464_v23 = vld [vmem:[#allocation7 + $0x340] sm:$0xff]  ;;  %v461_v24 = vld [vmem:[#allocation7 + $0x328] sm:$0xff] }
  0xa3   : > { %553 = vmatpush2.msra.mxu0 %v429_v28  ;;  %1522 = vmatpush3.msra.mxu1 %v392_v37  ;;  %v458_v25 = vld [vmem:[#allocation7 + $0x310] sm:$0xff]  ;;  %v2195_v29 = vld [vmem:[%s2150_s16 + $0x10] sm:$0xff] }
  0xa4   : > { %554 = vmatprep.subr.mxu0 %v427_v30  ;;  %1523 = vmatprep.subr.mxu1 %v437_v39  ;;  %v358_v26 = vld [vmem:[%s2150_s16 + $0x8] sm:$0xff]  ;;  %v357_v28 = vld [vmem:[%s2150_s16] sm:$0xff]  ;;  %s1803_s16 = sshll.u32 %s1937_s7, 4  ;;  %s1804_s16 = int_to_ptr.vmem [resolvable:$false] %s1803_s16 }
  0xa5   : > { %555 = vmatpush2.msra.mxu0 %v426_v32  ;;  %1524 = vmatpush3.msra.mxu1 %v389_v41  ;;  %s1805_s27 = scalar_lea.vmem %s1804_s16, 32  ;;  %p1806_p5 = scmp.lt.s32.totalorder %s1296_s12, %s1804_s16 }
  0xa6   : > { %556 = vmatprep.subr.mxu0 %v424_v34  ;;  %1525 = vmatprep.subr.mxu1 %v434_v43  ;;  %p1807_p2 = scmp.lt.s32.totalorder %s1805_s27, %s1799_s17 }
  0xa7   : > { %557 = vmatpush2.msra.mxu0 %v423_v36  ;;  %1526 = vmatpush3.msra.mxu1 %v386_v45 }
  0xa8   : > { %558 = vmatprep.subr.mxu0 %v421_v38  ;;  %1527 = vmatprep.subr.mxu1 %v431_v47  ;;  %p1808_p10 = por %p1807_p2, %p1806_p5 }
  0xa9   : > { %559 = vmatpush2.msra.mxu0 %v420_v40  ;;  %1528 = vmatpush3.msra.mxu1 %v383_v49 }
  0xaa   : > { %560 = vmatprep.subr.mxu0 %v418_v42  ;;  %1529 = vmatprep.subr.mxu1 %v428_v51  ;;  %p1809_p1 = pnand %p1808_p10, %p1802_p0 }
  0xab   : > { %561 = vmatpush2.msra.mxu0 %v417_v44  ;;  %1530 = vmatpush3.msra.mxu1 %v380_v53 }
  0xac   : > { %562 = vmatprep.subr.mxu0 %v415_v46  ;;  %1531 = vmatprep.subr.mxu1 %v425_v55 }
  0xad   : > { %563 = vmatpush2.msra.mxu0 %v414_v48  ;;  %1532 = vmatpush3.msra.mxu1 %v377_v57 }
  0xae   : > { %564 = vmatprep.subr.mxu0 %v412_v50  ;;  %1533 = vmatprep.subr.mxu1 %v422_v60 }
  0xaf   : > { %565 = vmatpush2.msra.mxu0 %v411_v52  ;;  %1534 = vmatpush3.msra.mxu1 %v374_v62 }
  0xb0   : > { %566 = vmatprep.subr.mxu0 %v409_v54  ;;  %1535 = vmatprep.subr.mxu1 %v419_v63 }
  0xb1   : > { %567 = vmatpush2.msra.mxu0 %v408_v56  ;;  %651 = vmatprep.mubr.f32.mxu1 %v1934_v0 }
  0xb2   : > { %569 = vmatmul.mubr.f32.vlgmr.msra.gmra.mxu0 %v2170_v58  ;;  %1572 = vmatprep.subr.mxu0 %v503_v59 }
  0xb3   : > { %1573 = vmatpush3.msra.mxu0 %v503_v59  ;;  %574 = vmatprep.mubr.f32.mxu0 %v2174_v2 }
  0xb4   : > { %1574 = vmatprep.subr.mxu0 %v500_v61  ;;  %1536 = vmatpush3.msra.mxu1 %v371_v4 }
  0xb5   : > { %1575 = vmatpush3.msra.mxu0 %v500_v61  ;;  %652 = vmatmul.mubr.f32.gmra.mxu1 %v2178_v5 }
  0xb6   : > { %1576 = vmatprep.subr.mxu0 %v497_v1  ;;  %575 = vmatmul.mubr.f32.gmra.mxu0 %v2182_v7 }
  0xb7   : > { %1577 = vmatpush3.msra.mxu0 %v497_v1  ;;  %1537 = vmatprep.subr.mxu1 %v416_v8 }
  0xb8   : > { %1578 = vmatprep.subr.mxu0 %v494_v3  ;;  %1538 = vmatpush3.msra.mxu1 %v368_v10 }
  0xb9   : > { %1579 = vmatpush3.msra.mxu0 %v494_v3  ;;  %1539 = vmatprep.subr.mxu1 %v413_v11 }
  0xba   : > { %1580 = vmatprep.subr.mxu0 %v491_v6  ;;  %1540 = vmatpush3.msra.mxu1 %v365_v14 }
  0xbb   : > { %1581 = vmatpush3.msra.mxu0 %v491_v6  ;;  %1541 = vmatprep.subr.mxu1 %v410_v15 }
  0xbc   : > { %1582 = vmatprep.subr.mxu0 %v488_v9  ;;  %1542 = vmatpush3.msra.mxu1 %v362_v17 }
  0xbd   : > { %1583 = vmatpush3.msra.mxu0 %v488_v9  ;;  %722 = vmatprep.mubr.f32.mxu1 %v2166_v27 }
  0xbe   : > { %1584 = vmatprep.subr.mxu0 %v485_v12  ;;  %723 = vmatmul.mubr.f32.vlgmr.msra.gmra.mxu1 %v2170_v58 }
  0xbf   : > { %1585 = vmatpush3.msra.mxu0 %v485_v12  ;;  %727 = vmatprep.mubr.f32.mxu1 %v2174_v2 }
  0xc0   : > { %1586 = vmatprep.subr.mxu0 %v482_v16  ;;  %1604 = vmatprep.mubr.f32.mxu0 %v2162_v13 }
  0xc1   : > { %1587 = vmatpush3.msra.mxu0 %v482_v16  ;;  %838 = vmatprep.subr.mxu1 %v358_v26 }
  0xc2   : > { %1588 = vmatprep.subr.mxu0 %v479_v18  ;;  %728 = vmatmul.mubr.f32.gmra.mxu1 %v2182_v7 }
  0xc3   : > { %1589 = vmatpush3.msra.mxu0 %v479_v18  ;;  %839 = vmatpush1.xpose.msra.mxu1 %v357_v28 }
  0xc4   : > { %1590 = vmatprep.subr.mxu0 %v476_v19  ;;  %1607 = vmatprep.subr.mxu1 %v2195_v29 }
  0xc5   : > { %1591 = vmatpush3.msra.mxu0 %v476_v19 }
  0xc6   : > { %1592 = vmatprep.subr.mxu0 %v473_v20 }
  0xc7   : > { %1593 = vmatpush3.msra.mxu0 %v473_v20 }
  0xc8   : > { %1594 = vmatprep.subr.mxu0 %v470_v21 }
  0xc9   : > { %1595 = vmatpush3.msra.mxu0 %v470_v21 }
  0xca   : > { %1596 = vmatprep.subr.mxu0 %v467_v22 }
  0xcb   : > { %1597 = vmatpush3.msra.mxu0 %v467_v22 }
  0xcc   : > { %1598 = vmatprep.subr.mxu0 %v464_v23 }
  0xcd   : > { %1599 = vmatpush3.msra.mxu0 %v464_v23 }
  0xce   : > { %1600 = vmatprep.subr.mxu0 %v461_v24 }
  0xcf   : > { %1601 = vmatpush3.msra.mxu0 %v461_v24 }
  0xd0   : > { %1602 = vmatprep.subr.mxu0 %v458_v25 }
  0xd1   : > { %1603 = vmatpush3.msra.mxu0 %v458_v25 }
  0xd2   : > { %1605 = vmatmul.mubr.f32.vlgmr.msra.gmra.mxu0 %v2178_v5 }
 0x157   : > { %v647_v30 = vpop.f32.mrf.mxu1 }
 0x159   : > { %v649_v32 = vpop.f32.mrf.mxu1 }
 0x172   : > { %v570_v31 = vpop.f32.mrf.mxu0 }
 0x173   : > { %v648_v35 = vadd.f32 %v647_v30, %v570_v31 }
 0x174   : > { %v572_v33 = vpop.f32.mrf.mxu0 }
 0x175   : > { %v650_v34 = vadd.f32 %v649_v32, %v572_v33  ;;  %v653_v36 = vpop.f32.mrf.mxu1 }
 0x176   : > { %v576_v37 = vpop.f32.mrf.mxu0 }
 0x177   : > { %872 = vmatprep.mubr.f32.mxu1 %v650_v34  ;;  %v655_v38 = vpop.f32.mrf.mxu1  ;;  %v654_v39 = vadd.f32 %v653_v36, %v576_v37 }
 0x178   : > { %873 = vmatmul.mubr.f32.vlgmr.msra.gmra.mxu1 %v648_v35  ;;  %v578_v40 = vpop.f32.mrf.mxu0 }
 0x179   : > { %1608 = vmatpush3.xpose.msra.mxu1 %v2195_v29  ;;  %v656_v41 = vadd.f32 %v655_v38, %v578_v40 }
 0x17a   : > { %1074 = vmatprep.subr.mxu1 %v358_v26 }
 0x17b   : > { %877 = vmatprep.mubr.f32.mxu1 %v656_v41 }
 0x17c   : > { %878 = vmatmul.mubr.f32.gmra.mxu1 %v654_v39 }
 0x17e   : > { %v1543_v42 = vpop.f32.mrf.mxu1 }
 0x180   : > { %v1544_v43 = vpop.f32.mrf.mxu1 }
 0x181   : > { %v1545_v48 = vadd.f32 %v1544_v43, %v1543_v42 }
 0x182   : > { %v1546_v44 = vpop.f32.mrf.mxu1 }
 0x184   : > { %v1547_v45 = vpop.f32.mrf.mxu1 }
 0x185   : > { %v1548_v46 = vadd.f32 %v1547_v45, %v1546_v44 }
 0x192   : > { %v1606_v47 = vpop.f32.mrf.mxu0 }
 0x193   : > { %v805_v51 = vadd.f32 %v1606_v47, %v1548_v46 }
 0x194   : > { %v799_v49 = vpop.f32.mrf.mxu0 }
 0x195   : > { %v800_v50 = vadd.f32 %v1545_v48, %v799_v49 }
 0x197   : > { %1609 = vmatprep.mubr.f32.mxu1 %v800_v50 }
 0x198   : > { %1610 = vmatmul.mubr.f32.vlgmr.msra.gmra.mxu1 %v805_v51 }
 0x199   : > { %1075 = vmatpush1.msra.mxu1 %v357_v28  ;;  %1108 = vmatprep.mubr.f32.mxu1 %v1934_v0 }
 0x19a   : > { %1612 = vmatprep.subr.mxu1 %v1934_v0 }
 0x238   : > { %v874_v52 = vpop.f32.mrf.mxu1 }
 0x23a   : > { %v876_v53 = vpop.f32.mrf.mxu1 }
 0x23c   : > { %v879_v54 = vpop.f32.mrf.mxu1 }
 0x23e   : > { %v881_v55 = vpop.f32.mrf.mxu1 }
 0x258   : > { %v1611_v56 = vpop.f32.mrf.mxu1 }
 0x259   : > { %v955_v57 = vadd.f32 %v1611_v56, %v879_v54 }
 0x25a   : > { %v949_v59 = vpop.f32.mrf.mxu1 }
 0x25b   : > { %1703 = vtanh.f32 %v955_v57  ;;  %v950_v60 = vadd.f32 %v949_v59, %v874_v52 }
 0x25d   : > { %1705 = vtanh.f32 %v950_v60 }
 0x268   : > { %v1704_v61 = vpop.eup %1703 }
 0x269   : > { %v964_v1 = vsel %vm960_vm0, %v1704_v61, -inf }
 0x26a   : > { %v1706_v62 = vpop.eup %1705 }
 0x26b   : > { %v961_v63 = vsel %vm960_vm0, %v1706_v62, -inf  ;;  %v1935_v62 = vmov 1966171168  }
 0x26c   : > { %962 = vmax.xlane.f32.xlu1 %v961_v63  ;;  %v1021_v3 = vmax.f32 %v961_v63, %v964_v1  ;;  %v1195_v63 = vlaneseq }
 0x26e   : > { %v1022_v4 = vrot.slane %v1021_v3, 4  ;;  %vm2224_vm5 = vcmp.lt.s32.totalorder %v1195_v63, 384 }
 0x270   : > { %965 = vmax.xlane.f32.xlu1 %v964_v1  ;;  %v1023_v6 = vmax.f32 %v1021_v3, %v1022_v4 }
 0x272   : > { %v1024_v8 = vrot.slane %v1023_v6, 2 }
 0x274   : > { %v1025_v9 = vmax.f32 %v1023_v6, %v1024_v8 }
 0x276   : > { %v1026_v10 = vrot.slane %v1025_v9, 1 }
 0x278   : > { %v1027_v11 = vmax.f32 %v1025_v9, %v1026_v10 }
 0x27a   : > { %vm1028_vm1 = vcmp.eq.f32.partialorder %v1027_v11, 0.0 }
 0x27b   : > { %v1029_v12 = vsel %vm1028_vm1, -1e+09, %v1027_v11 }
 0x27c   : > { %v1030_v14 = vsel %vm960_vm0, %v1029_v12, -inf }
 0x27d   : > { %1031 = vmax.xlane.f32.xlu0 %v1030_v14 }
 0x2f5   : > { %v963_v15 = vpop.xlane.xlu1 %962 }
 0x2f6   : > { %vm967_vm2 = vcmp.eq.f32.partialorder %v963_v15, 0.0 }
 0x2f7   : > { %v969_v17 = vsel %vm967_vm2, -1e+09, %v963_v15 }
 0x2f9   : > { %v966_v16 = vpop.xlane.xlu1 %965 }
 0x2fa   : > { %vm968_vm3 = vcmp.eq.f32.partialorder %v966_v16, 0.0 }
 0x2fb   : > { %v970_v18 = vsel %vm968_vm3, -1e+09, %v966_v16 }
 0x2fc   : > { %v971_v19 = vmax.f32 %v969_v17, %v970_v18 }
 0x2fe   : > { %v972_v20 = vrot.slane %v971_v19, 4 }
 0x300   : > { %v973_v21 = vmax.f32 %v971_v19, %v972_v20 }
 0x302   : > { %v974_v22 = vrot.slane %v973_v21, 2 }
 0x304   : > { %v975_v23 = vmax.f32 %v973_v21, %v974_v22 }
 0x306   : > { %v976_v24 = vrot.slane %v975_v23, 1  ;;  %v1032_v25 = vpop.xlane.xlu0 %1031 }
 0x307   : > { %v1033_v26 = vsub.f32 %v1029_v12, %v1032_v25 }
 0x308   : > { %v977_v28 = vmax.f32 %v975_v23, %v976_v24 }
 0x309   : > { %v1034_v30 = vmul.f32 1.442695, %v1033_v26 }
 0x30a   : > { %v978_v31 = vsub.f32 %v969_v17, %v977_v28  ;;  %v979_v32 = vsub.f32 %v970_v18, %v977_v28 }
 0x30b   : > { %1707 = vpow2.f32 %v1034_v30 }
 0x30c   : > { %v980_v33 = vmul.f32 1.442695, %v978_v31  ;;  %v982_v34 = vmul.f32 1.442695, %v979_v32 }
 0x30e   : > { %1709 = vpow2.f32 %v980_v33 }
 0x30f   : > { %1711 = vpow2.f32 %v982_v34 }
 0x318   : > { %v2204_v35 = vpop.eup %1707 }
 0x319   : > { %v1036_v36 = vsel %vm960_vm0, %v2204_v35, 0.0 }
 0x31a   : > { %1037 = vadd.xlane.f32.xlu0 %v1036_v36 }
 0x31b   : > { %v1710_v37 = vpop.eup %1709 }
 0x31c   : > { %v1712_v38 = vpop.eup %1711 }
 0x31d   : > { %v984_v39 = vadd.f32 %v1712_v38, %v1710_v37 }
 0x31f   : > { %v985_v40 = vrot.slane %v984_v39, 4 }
 0x321   : > { %v986_v41 = vadd.f32 %v985_v40, %v984_v39 }
 0x323   : > { %v987_v42 = vrot.slane %v986_v41, 2 }
 0x325   : > { %v988_v43 = vadd.f32 %v987_v42, %v986_v41 }
 0x327   : > { %v989_v44 = vrot.slane %v988_v43, 1 }
 0x329   : > { %v990_v45 = vadd.f32 %v989_v44, %v988_v43 }
 0x32b   : > { %1713 = vrcp.f32 %v990_v45 }
 0x338   : > { %v1714_v46 = vpop.eup %1713 }
 0x339   : > { %v992_v47 = vmul.f32 %v1714_v46, %v1710_v37  ;;  %v993_v48 = vmul.f32 %v1714_v46, %v1712_v38 }
 0x33b   : > { %v994_v49 = vmul.f32 %v992_v47, %v2170_v58  ;;  %v995_v50 = vmul.f32 %v992_v47, %v2166_v27  ;;  %v997_v51 = vmul.f32 %v993_v48, %v2182_v7  ;;  %v998_v52 = vmul.f32 %v993_v48, %v2174_v2  ;;  %1186 = vst.msk [vmem:[%s350_s10] sm:$0xff] %vm1185_vm4, %v992_v47 }
 0x33c   : > { %1187 = vst.msk [vmem:[%s350_s10 + $0x8] sm:$0xff] %vm1185_vm4, %v993_v48  ;;  %v999_v53 = vmul.f32 %v993_v48, %v2178_v5  ;;  %v996_v54 = vmul.f32 %v992_v47, %v2162_v13  ;;  %v1193_v58 = vunpack.c.l.s4 %v1935_v62  ;;  %v1196_v5 = vshrl.u32 %v1195_v63, 7 }
 0x33d   : > { %v1000_v55 = vadd.f32 %v997_v51, %v994_v49  ;;  %v1007_v56 = vadd.f32 %v998_v52, %v995_v50 }
 0x33e   : > { %v1014_v57 = vadd.f32 %v999_v53, %v996_v54  ;;  %v1194_v6 = vunpack.c.0.s8 %v1193_v58 }
 0x33f   : > { %v1001_v59 = vrot.slane %v1000_v55, 4  ;;  %v1008_v60 = vrot.slane %v1007_v56, 4 }
 0x340   : > { %v1015_v61 = vrot.slane %v1014_v57, 4  ;;  %v2219_v14 = vsub.s32 %v1194_v6, %v1196_v5 }
 0x341   : > { %v1002_v27 = vadd.f32 %v1001_v59, %v1000_v55  ;;  %v1009_v1 = vadd.f32 %v1008_v60, %v1007_v56 }
 0x342   : > { %v1016_v7 = vadd.f32 %v1015_v61, %v1014_v57 }
 0x343   : > { %v1003_v3 = vrot.slane %v1002_v27, 2  ;;  %v1010_v2 = vrot.slane %v1009_v1, 2 }
 0x344   : > { %v1017_v4 = vrot.slane %v1016_v7, 2 }
 0x345   : > { %v1004_v8 = vadd.f32 %v1003_v3, %v1002_v27  ;;  %v1011_v13 = vadd.f32 %v1010_v2, %v1009_v1 }
 0x346   : > { %v1018_v9 = vadd.f32 %v1017_v4, %v1016_v7 }
 0x347   : > { %v1005_v10 = vrot.slane %v1004_v8, 1  ;;  %v1012_v11 = vrot.slane %v1011_v13, 1 }
 0x348   : > { %v1019_v12 = vrot.slane %v1018_v9, 1 }
 0x349   : > { %v1006_v15 = vadd.f32 %v1005_v10, %v1004_v8  ;;  %v1013_v16 = vadd.f32 %v1012_v11, %v1011_v13 }
 0x34a   : > { %v1020_v17 = vadd.f32 %v1019_v12, %v1018_v9 }
 0x34b   : > { %v1191_v18 = vcombine.low %v1006_v15, %v1013_v16 }
 0x34c   : > { %v1205_v20 = vrot.slane %v1020_v17, %v2219_v14 }
 0x34d   : > { %v1198_v19 = vrot.slane %v1191_v18, %v2219_v14 }
 0x34f   : > { %v1206_v21 = vcombine.low %v1198_v19, %v1205_v20 }
 0x351   : > { %v1213_v23 = vrot.slane %v1206_v21, %v2219_v14 }
 0x353   : > { %1219 = vst.msk [vmem:[%s2231_s2] sm:$0x7] %vm2224_vm5, %v1213_v23 }
 0x3a3   : > { %v1038_v24 = vpop.xlane.xlu0 %1037 }
 0x3a4   : > { %1715 = vrcp.f32 %v1038_v24 }
 0x3b1   : > { %v1716_v25 = vpop.eup %1715 }
 0x3b2   : > { %v1040_v26 = vmul.f32 %v1716_v25, %v2204_v35 }
 0x3b4   : > { %1503 = vmatmul.mubr.msk.f32.vlgmr.msra.gmra.mxu1 %vm960_vm0, %v1040_v26  ;;  %1221 = vst.msk [vmem:[%s338_s13] sm:$0x1] %vm1220_vm6, %v1040_v26 }
 0x3b5   : > { %1613 = vmatpush3.msra.mxu1 %v2195_v29  ;;  %1614 = vmatprep.mubr.msk.f32.mxu1 %vm1936_vm7, %v1934_v0 }
 0x3b8   : > { %1615 = vmatmul.mubr.msk.f32.vlgmr.msra.gmra.mxu1 %vm960_vm0, %v1040_v26 }
 0x3b9   : > { %1812 = shalt.err (!%p1809_p1)
}
 0x3ba   : > { %s1813_s8 = scalar_lea.hbm %s1293_s30, 16  ;;  %s1817_s19 = scalar_lea.hbm %s2333_s5, 32 }
 0x3bb   : > { %p1814_p4 = scmp.ne.s32.totalorder %s1293_s30, %s1813_s8  ;;  %p1818_p8 = scmp.lt.s32.totalorder %s1293_s30, %s2333_s5 }
 0x3bc   : > { %p1819_p11 = scmp.lt.s32.totalorder %s1817_s19, %s1813_s8 }
 0x3bd   : > { %p1815_p6 = pnand %p1814_p4, %p2365_p12 }
 0x3be   : > { %p1820_p3 = por %p1819_p11, %p1818_p8 }
 0x3bf   : > { %p1816_p7 = pneg %p1815_p6 }
 0x3c1   : > { %p1821_p9 = pnand %p1820_p3, %p1816_p7 }
 0x3c3   : > { %1824 = shalt.err (!%p1821_p9)
}
 0x3c4   : > { %1635 = dma.vmem_to_hbm [thread:$0]  (%p2365_p12), %s1296_s12, 16, %s1293_s30, %s2248_s20  }
 0x3c5   : > { %s1624_s0 = smul.u32 48, %s1996_s25  ;;  %s1282_s14 = sshll.u32 %s2231_s2, 4  ;;  %s1283_s14 = int_to_ptr.vmem [resolvable:$true] %s1282_s14 }
 0x3c6   : > { %s1256_s16 = scalar_lea.sflag [#allocation4], %s2136_s23  ;;  %s1825_s27 = scalar_lea.vmem %s1283_s14, 48 }
 0x3c7   : > { %s1280_s7 = scalar_lea.hbm %s2332_s4, %s1624_s0  ;;  %p1826_p13 = scmp.ne.s32.totalorder %s1283_s14, %s1825_s27 }
 0x3c8   : > { %s1938_s8 = smov [#allocation8]  }
 0x3c9   : > { %p1827_p0 = pnand %p1826_p13, %p2365_p12  ;;  %s1829_s29 = sshll.u32 %s1938_s8, 4  ;;  %s1830_s29 = int_to_ptr.vmem [resolvable:$false] %s1829_s29 }
 0x3ca   : > { %s1831_s26 = scalar_lea.vmem %s1830_s29, 96  ;;  %p1832_p2 = scmp.lt.s32.totalorder %s1283_s14, %s1830_s29 }
 0x3cb   : > { %p1828_p5 = pneg %p1827_p0  ;;  %p1833_p10 = scmp.lt.s32.totalorder %s1831_s26, %s1825_s27 }
 0x3cd   : > { %p1834_p1 = por %p1833_p10, %p1832_p2 }
 0x3cf   : > { %p1835_p4 = pnand %p1834_p1, %p1828_p5 }
 0x3d1   : > { %1838 = shalt.err (!%p1835_p4)
}
 0x3d2   : > { %s1839_s2 = scalar_lea.hbm %s1280_s7, 48  ;;  %s1843_s19 = scalar_lea.hbm %s2332_s4, 96 }
 0x3d3   : > { %p1840_p6 = scmp.ne.s32.totalorder %s1280_s7, %s1839_s2  ;;  %p1844_p11 = scmp.lt.s32.totalorder %s1280_s7, %s2332_s4 }
 0x3d4   : > { %p1845_p3 = scmp.lt.s32.totalorder %s1843_s19, %s1839_s2 }
 0x3d5   : > { %p1841_p7 = pnand %p1840_p6, %p2365_p12 }
 0x3d6   : > { %p1846_p9 = por %p1845_p3, %p1844_p11 }
 0x3d7   : > { %p1842_p8 = pneg %p1841_p7 }
 0x3d9   : > { %p1847_p13 = pnand %p1846_p9, %p1842_p8 }
 0x3db   : > { %1850 = shalt.err (!%p1847_p13)
}
 0x3dc   : > { %1634 = dma.vmem_to_hbm [thread:$0]  (%p2365_p12), %s1283_s14, 48, %s1280_s7, %s1256_s16  }
 0x3dd   : > { %s345_s11 = scalar_lea.vmem [#allocation11], %s1623_s15  ;;  %s1307_s14 = scalar_lea.hbm %s2334_s6, %s1624_s0 }
 0x3de   : > { %s1309_s17 = sshll.u32 %s345_s11, 4  ;;  %s1939_s23 = smov [#allocation11]   ;;  %s1310_s17 = int_to_ptr.vmem [resolvable:$true] %s1309_s17 }
 0x3df   : > { %s1851_s7 = scalar_lea.vmem %s1310_s17, 48  ;;  %s1855_s15 = sshll.u32 %s1939_s23, 4  ;;  %s1856_s15 = int_to_ptr.vmem [resolvable:$false] %s1855_s15 }
 0x3e0   : > { %p1852_p0 = scmp.ne.s32.totalorder %s1310_s17, %s1851_s7  ;;  %s1857_s16 = scalar_lea.vmem %s1856_s15, 96 }
 0x3e1   : > { %p1858_p10 = scmp.lt.s32.totalorder %s1310_s17, %s1856_s15  ;;  %p1859_p1 = scmp.lt.s32.totalorder %s1857_s16, %s1851_s7 }
 0x3e2   : > { %p1853_p5 = pnand %p1852_p0, %p2365_p12 }
 0x3e3   : > { %p1860_p4 = por %p1859_p1, %p1858_p10 }
 0x3e4   : > { %p1854_p2 = pneg %p1853_p5 }
 0x3e6   : > { %p1861_p6 = pnand %p1860_p4, %p1854_p2 }
 0x474   : > { %v1110_v0 = vpop.f32.mrf.mxu1 }
 0x476   : > { %v1112_v29 = vpop.f32.mrf.mxu1 }
 0x477   : > { %v1225_v28 = vcombine.low %v1110_v0, %v1112_v29 }
 0x478   : > { %v1181_v30 = vpop.f32.mrf.mxu1 }
 0x479   : > { %v1232_v31 = vrot.slane %v1225_v28, %v2219_v14  ;;  %v1239_v32 = vrot.slane %v1181_v30, %v2219_v14 }
 0x47a   : > { %v1616_v33 = vpop.f32.mrf.mxu1 }
 0x47b   : > { %v1240_v34 = vcombine.low %v1232_v31, %v1239_v32 }
 0x47d   : > { %v1247_v35 = vrot.slane %v1240_v34, %v2219_v14 }
 0x47f   : > { %1249 = vst.msk [vmem:[%s345_s11] sm:$0x7] %vm2224_vm5, %v1247_v35 }
 0x480   : > { %1864 = shalt.err (!%p1861_p6)
}
 0x481   : > { %s1865_s25 = scalar_lea.hbm %s1307_s14, 48  ;;  %s1869_s26 = scalar_lea.hbm %s2334_s6, 96 }
 0x482   : > { %p1866_p7 = scmp.ne.s32.totalorder %s1307_s14, %s1865_s25  ;;  %p1870_p3 = scmp.lt.s32.totalorder %s1307_s14, %s2334_s6 }
 0x483   : > { %p1871_p9 = scmp.lt.s32.totalorder %s1869_s26, %s1865_s25 }
 0x484   : > { %p1867_p8 = pnand %p1866_p7, %p2365_p12 }
 0x485   : > { %p1872_p13 = por %p1871_p9, %p1870_p3 }
 0x486   : > { %p1868_p11 = pneg %p1867_p8 }
 0x488   : > { %p1873_p0 = pnand %p1872_p13, %p1868_p11 }
 0x48a   : > { %1876 = shalt.err (!%p1873_p0)
}
 0x48b   : > { %1636 = dma.vmem_to_hbm [thread:$0]  (%p2365_p12), %s1310_s17, 48, %s1307_s14, %s2248_s20  }
 0x48c PF: > { %s1329_s12 = sand.u32 1, %s1915_s21   ;;  %p2366_p5 = scmp.ne.s32.totalorder %s2347_s28, 0 }
 0x48d   : > { %p2367_p2 = scmp.ge.s32.totalorder %s1927_s24, 2  ;;  %s1330_s19 = scalar_lea.sflag [#allocation4], %s1329_s12 }
 0x48f   : > { %p1652_p10 = pnand %p2367_p2, %p2366_p5 }
 0x491   : > { %p1653_p1 = pneg %p1652_p10 }
 0x493   : > { %1906 = dma.done.wait (%p1653_p1), %s1330_s19, 48  }
 0x494   : > { %1908 = vsyncadd (%p1653_p1), %s1330_s19, 4294967248  ;;  %s2368_s10 = sadd.s32 4294967294, %s1927_s24  }
 0x495   : > { %s1338_s13 = sand.u32 1, %s2368_s10  }
 0x496   : > { %s1339_s11 = scalar_lea.sflag [#allocation10], %s1338_s13 }
 0x497   : > { %1910 = dma.done.wait (%p1653_p1), %s1339_s11, 64  }
 0x498   : > { %1912 = vsyncadd (%p1653_p1), %s1339_s11, 4294967232  ;;  %s2369_s18 = sld [smem:[#allocation17_spill]]  ;;  %p26_p12 = scmp.ge.s32.totalorder %s2031_s9, 4  }
 0x499   : > { %s2370_s23 = sld [smem:[#allocation18_spill]]  ;;  %s2371_s21 = smov %s1919_s22 }
 0x49a   : > { %s2373_s24 = smov %s2031_s9  ;;  %28 = sbr.rel (!%p26_p12) target bundleno = 12 (0xc), region = 138 }
 0x49e   : > { %s2372_s22 = smov %s2369_s18 }
 0x49f   :  { %1352 = vsyncpa [#allocation3], 1 }
 0x4a0   :  { %1354 = vsyncpa [#allocation3 + $0x1], 1 }
 0x4a1   :  { %1355 = vsyncpa [#allocation6], 1 }
 0x4a2   :  { %1357 = vsyncpa [#allocation6 + $0x1], 1 }
 0x4a3   :  { %1358 = vsyncpa [#allocation4], 1 }
 0x4a4   :  { %1360 = vsyncpa [#allocation4 + $0x1], 1 }
 0x4a5   :  { %1361 = vsyncpa [#allocation10], 1 }
 0x4a6   :  { %1363 = vsyncpa [#allocation10 + $0x1], 1 }

</bundles_post_ra>
